<compile_context>
chip_gen: v6e
topology: v6e:2x2x1
jax: 0.10.0
libtpu: 0.0.40
codegen_flags: <defaults>
</compile_context>

<pallas_src>
import numpy as np

import jax
import jax.numpy as jnp
from jax import lax
from jax.experimental import pallas as pl
from jax.experimental.pallas import tpu as pltpu

LN_EPS = 1e-5   # nn.LayerNorm default
BN_EPS = 1e-5   # nn.BatchNorm1d default

DIMS = [12, 4, 2, 4, 11]                 # N[1:] from the module
STARTS = [0, 12, 16, 18, 22]             # feature offsets inside the 33-wide input
SLICES = [(s, s + d) for s, d in zip(STARTS, DIMS)]
H = len(DIMS)                            # 5 encoder "heads"
DP = 16                                  # padded per-head width
PACKED = H * DP                          # 80  (packed feature axis)
DFF = 32                                 # dim_feedforward
FF_ALL = H * DFF                         # 160
D_OUT = 10                               # final Linear output
PAD_F = 40                               # 33 input features zero-padded to a multiple of 8
QKV_W = 384                              # fused QKV output width: q@0, k@128, v@256
K_COL = 128
V_COL = 256
VEC_ROWS = 16                            # bias / LN vector slab rows (padded to a sublane tile)


def _w80_layout(HR):
    """Row offsets inside the 80-column weight slab (shared by packer and kernel)."""
    HRp = ((HR + 7) // 8) * 8
    off = {}
    off["P"] = 0                          # (PAD_F, 80)  input scatter
    off["W2"] = PAD_F                     # (160, 80)    FFN down
    off["WO"] = off["W2"] + FF_ALL        # (80, 80)     attention output proj
    off["MS"] = off["WO"] + PACKED        # (80, 80)     segmented-mean matrix
    off["WL"] = off["MS"] + PACKED        # (80, 80)     final Linear (+BN), cols 0:10
    off["HM"] = off["WL"] + PACKED        # (HR, 80)     per-head column mask (0/1)
    off["AM"] = off["HM"] + HRp           # (HR, R)      additive same-batch mask (0/-1e30)
    off["ROWS"] = off["AM"] + HRp
    return off


# ----------------------------------------------------------------------------
# Fused Pallas kernel (single gridless launch, everything resident in VMEM)
# ----------------------------------------------------------------------------
def _fused_kernel(x_ref, wwide_ref, w80_ref, vec_ref, o_ref):
    B, S, Fp = x_ref.shape
    R = B * S
    HR = H * R
    off = _w80_layout(HR)

    x = x_ref[...].reshape(R, Fp)                                   # (R, 40)

    # scatter the 33 features into the zero-padded 80-wide packed layout (one MXU op)
    xp = jnp.dot(x, w80_ref[pl.ds(off["P"], PAD_F), :],
                 preferred_element_type=jnp.float32)                # (R, 80)

    # fused Q/K/V projection for all 5 encoders (block-diagonal weights, softmax scale
    # folded into Q, segments at 128-aligned lane starts)
    qkv = jnp.dot(xp, wwide_ref[pl.ds(0, PACKED), :],
                  preferred_element_type=jnp.float32) + vec_ref[pl.ds(0, 1), :]
    q = qkv[:, 0:PACKED]                                            # (R, 80)
    k = qkv[:, K_COL:K_COL + PACKED]
    v = qkv[:, V_COL:V_COL + PACKED]

    # replicate queries head-major (rows = (head, batch*seq)) and mask each replica to its
    # head's columns -> one score matmul covers all (head, batch) pairs, no lane reshapes
    hm = w80_ref[pl.ds(off["HM"], HR), :]                           # (HR, 80) 0/1 constant
    qh = jnp.concatenate([q] * H, axis=0) * hm                      # (HR, 80)

    scores = lax.dot_general(qh, k, (((1,), (1,)), ((), ())),
                             preferred_element_type=jnp.float32)    # (HR, R)
    scores = scores + w80_ref[pl.ds(off["AM"], HR), pl.ds(0, R)]    # same-batch mask
    scores = scores - jnp.max(scores, axis=-1, keepdims=True)
    pexp = jnp.exp(scores)
    pexp = pexp * pl.reciprocal(jnp.sum(pexp, axis=-1, keepdims=True), approx=False)

    # attention values; mask each head-row-block back to its own columns, then collapse the
    # 5 (sublane-aligned) row blocks into the packed (R, 80) layout
    ah = jnp.dot(pexp, v, preferred_element_type=jnp.float32) * hm  # (HR, 80)
    attn = ah[0:R, :]
    for h in range(1, H):
        attn = attn + ah[h * R:(h + 1) * R, :]                      # (R, 80)

    # attention output projection
    attn = (jnp.dot(attn, w80_ref[pl.ds(off["WO"], PACKED), :],
                    preferred_element_type=jnp.float32)
            + vec_ref[pl.ds(1, 1), pl.ds(0, PACKED)])

    msum = w80_ref[pl.ds(off["MS"], PACKED), :]                     # segmented-mean matrix

    # residual + per-head LayerNorm 1 (stats over valid columns only; padded cols stay 0)
    h1 = xp + attn
    mu1 = jnp.dot(h1, msum, preferred_element_type=jnp.float32)
    c1 = h1 - mu1
    var1 = jnp.dot(c1 * c1, msum, preferred_element_type=jnp.float32)
    n1 = (c1 * lax.rsqrt(var1 + LN_EPS) * vec_ref[pl.ds(2, 1), pl.ds(0, PACKED)]
          + vec_ref[pl.ds(3, 1), pl.ds(0, PACKED)])

    # feed-forward (ReLU) for all 5 encoders at once
    f = (jnp.dot(n1, wwide_ref[pl.ds(PACKED, PACKED), pl.ds(0, FF_ALL)],
                 preferred_element_type=jnp.float32)
         + vec_ref[pl.ds(4, 1), pl.ds(0, FF_ALL)])
    f = jnp.maximum(f, 0.0)
    f = (jnp.dot(f, w80_ref[pl.ds(off["W2"], FF_ALL), :],
                 preferred_element_type=jnp.float32)
         + vec_ref[pl.ds(5, 1), pl.ds(0, PACKED)])

    # residual + per-head LayerNorm 2
    h2 = n1 + f
    mu2 = jnp.dot(h2, msum, preferred_element_type=jnp.float32)
    c2 = h2 - mu2
    var2 = jnp.dot(c2 * c2, msum, preferred_element_type=jnp.float32)
    n2 = (c2 * lax.rsqrt(var2 + LN_EPS) * vec_ref[pl.ds(6, 1), pl.ds(0, PACKED)]
          + vec_ref[pl.ds(7, 1), pl.ds(0, PACKED)])

    # "concat" + final Linear + eval BatchNorm (both folded into the weight slab)
    y = jnp.dot(n2, w80_ref[pl.ds(off["WL"], PACKED), :],
                preferred_element_type=jnp.float32)                 # (R, 80), cols 0:10 valid
    y = y[:, 0:D_OUT] + vec_ref[pl.ds(8, 1), pl.ds(0, D_OUT)]
    o_ref[...] = y.reshape(B, S, D_OUT)


# ----------------------------------------------------------------------------
# Host-side parameter packing (numpy, runs ONCE — not inside the jitted forward)
# ----------------------------------------------------------------------------
def pack_params(enc_params, liner_params, batch, seq):
    f32 = np.float32
    R = batch * seq
    HR = H * R
    off = _w80_layout(HR)

    w_wide = np.zeros((2 * PACKED, QKV_W), f32)   # rows 0:80 = Wqkv, rows 80:160 cols 0:160 = W1
    w_80 = np.zeros((off["ROWS"], PACKED), f32)
    vecs = np.zeros((VEC_ROWS, QKV_W), f32)

    for h, (d, s, prm) in enumerate(zip(DIMS, STARTS, enc_params)):
        (wq, bq, wk, bk, wv, bv, wo, bo,
         ln1w, ln1b, w1, b1, w2, b2, ln2w, ln2b) = [np.asarray(p, f32) for p in prm]
        o = h * DP
        fo = h * DFF
        sc = 1.0 / float(d) ** 0.5                 # softmax 1/sqrt(d) folded into Q

        w_80[off["P"] + s:off["P"] + s + d, o:o + d] = np.eye(d, dtype=f32)

        w_wide[o:o + d, o:o + d] = wq * sc
        w_wide[o:o + d, K_COL + o:K_COL + o + d] = wk
        w_wide[o:o + d, V_COL + o:V_COL + o + d] = wv
        vecs[0, o:o + d] = bq.reshape(-1) * sc
        vecs[0, K_COL + o:K_COL + o + d] = bk.reshape(-1)
        vecs[0, V_COL + o:V_COL + o + d] = bv.reshape(-1)

        w_80[off["WO"] + o:off["WO"] + o + d, o:o + d] = wo
        vecs[1, o:o + d] = bo.reshape(-1)
        vecs[2, o:o + d] = ln1w.reshape(-1)
        vecs[3, o:o + d] = ln1b.reshape(-1)

        w_wide[PACKED + o:PACKED + o + d, fo:fo + DFF] = w1
        vecs[4, fo:fo + DFF] = b1.reshape(-1)
        w_80[off["W2"] + fo:off["W2"] + fo + DFF, o:o + d] = w2
        vecs[5, o:o + d] = b2.reshape(-1)
        vecs[6, o:o + d] = ln2w.reshape(-1)
        vecs[7, o:o + d] = ln2b.reshape(-1)

        # segmented mean: sums the d valid columns of head h, broadcast over its 16 columns
        w_80[off["MS"] + o:off["MS"] + o + d, o:o + DP] = 1.0 / d
        # per-head column mask (head-major row blocks)
        w_80[off["HM"] + h * R:off["HM"] + (h + 1) * R, o:o + d] = 1.0

    # final Linear(33,10) on the packed layout with eval BatchNorm folded in
    wl, bl, gamma, beta, rmean, rvar = [np.asarray(p, f32) for p in liner_params]
    bn_scale = (gamma / np.sqrt(rvar + BN_EPS)).reshape(-1)
    for h, (d, s) in enumerate(zip(DIMS, STARTS)):
        w_80[off["WL"] + h * DP:off["WL"] + h * DP + d, 0:D_OUT] = wl[s:s + d, :]
    w_80[off["WL"]:off["WL"] + PACKED, 0:D_OUT] *= bn_scale[None, :]
    vecs[8, 0:D_OUT] = (bl.reshape(-1) - rmean.reshape(-1)) * bn_scale + beta.reshape(-1)

    # additive same-batch mask for the head-major score rows: (HR, R), 0 / -1e30
    a = np.arange(HR)
    row_b = (a % R) // seq
    col_b = np.arange(R) // seq
    w_80[off["AM"]:off["AM"] + HR, 0:R] = np.where(
        row_b[:, None] == col_b[None, :], 0.0, -1e30).astype(f32)

    return w_wide, w_80, vecs


# ----------------------------------------------------------------------------
# pallas_call wrapper (gridless, full-array VMEM operands)
# ----------------------------------------------------------------------------
@jax.jit
def _forward_impl(x_eye, w_wide, w_80, vecs):
    B, S, F = x_eye.shape
    R, HR = B * S, H * B * S
    x40 = jnp.pad(x_eye.astype(jnp.float32), ((0, 0), (0, 0), (0, PAD_F - F)))

    flops = 2 * (R * PAD_F * PACKED                      # input scatter
                 + R * PACKED * QKV_W                    # fused QKV
                 + HR * PACKED * R + HR * R * PACKED     # scores + PV
                 + R * PACKED * PACKED                   # output proj
                 + 4 * R * PACKED * PACKED               # 2 LayerNorms (mean + var)
                 + R * PACKED * FF_ALL + R * FF_ALL * PACKED   # FFN
                 + R * PACKED * PACKED)                  # final Linear
    transcendentals = HR * R + 4 * R * PACKED
    bytes_accessed = 4 * (int(x40.size) + int(w_wide.size) + int(w_80.size)
                          + int(vecs.size) + B * S * D_OUT)

    return pl.pallas_call(
        _fused_kernel,
        out_shape=jax.ShapeDtypeStruct((B, S, D_OUT), jnp.float32),
        cost_estimate=pl.CostEstimate(flops=flops,
                                      transcendentals=transcendentals,
                                      bytes_accessed=bytes_accessed),
    )(x40, w_wide, w_80, vecs)


def build_forward(enc_params, liner_params, batch, seq):
    """Packs parameters once (host-side numpy) and returns a forward(x) callable."""
    slabs = [jnp.asarray(s) for s in pack_params(enc_params, liner_params, batch, seq)]

    def forward(x_eye):
        return _forward_impl(x_eye, *slabs)

    return forward


# ----------------------------------------------------------------------------
# Deterministic parameter init (shapes from the module __init__)
# ----------------------------------------------------------------------------
def _uni(key, shape, fan_in):
    b = 1.0 / (float(fan_in) ** 0.5)
    return jax.random.uniform(key, shape, jnp.float32, minval=-b, maxval=b)


def init_encoder_params(key, d, dff=DFF):
    ks = jax.random.split(key, 12)
    wq = _uni(ks[0], (d, d), d);   bq = _uni(ks[1], (1, d), d)
    wk = _uni(ks[2], (d, d), d);   bk = _uni(ks[3], (1, d), d)
    wv = _uni(ks[4], (d, d), d);   bv = _uni(ks[5], (1, d), d)
    wo = _uni(ks[6], (d, d), d);   bo = _uni(ks[7], (1, d), d)
    ln1w = jnp.ones((1, d), jnp.float32); ln1b = jnp.zeros((1, d), jnp.float32)
    w1 = _uni(ks[8], (d, dff), d);    b1 = _uni(ks[9], (1, dff), d)
    w2 = _uni(ks[10], (dff, d), dff); b2 = _uni(ks[11], (1, d), dff)
    ln2w = jnp.ones((1, d), jnp.float32); ln2b = jnp.zeros((1, d), jnp.float32)
    return [wq, bq, wk, bk, wv, bv, wo, bo, ln1w, ln1b, w1, b1, w2, b2, ln2w, ln2b]


def init_liner_params(key):
    ks = jax.random.split(key, 2)
    w = _uni(ks[0], (33, D_OUT), 33)
    b = _uni(ks[1], (1, D_OUT), 33)
    gamma = jnp.ones((1, D_OUT), jnp.float32)
    beta = jnp.zeros((1, D_OUT), jnp.float32)
    rmean = jnp.zeros((1, D_OUT), jnp.float32)
    rvar = jnp.ones((1, D_OUT), jnp.float32)
    return [w, b, gamma, beta, rmean, rvar]


# ----------------------------------------------------------------------------
# Pure-JAX reference (per-slice, unpacked) for correctness check
# ----------------------------------------------------------------------------
def _ref_layer_norm(x, w, b):
    mu = jnp.mean(x, axis=-1, keepdims=True)
    var = jnp.mean((x - mu) ** 2, axis=-1, keepdims=True)
    return (x - mu) * lax.rsqrt(var + LN_EPS) * w + b


def _ref_encoder_layer(x, p):
    wq, bq, wk, bk, wv, bv, wo, bo, ln1w, ln1b, w1, b1, w2, b2, ln2w, ln2b = p
    d = x.shape[-1]
    q = x @ wq + bq; k = x @ wk + bk; v = x @ wv + bv
    scores = jnp.einsum('bqd,bkd->bqk', q, k) / (float(d) ** 0.5)
    attn = jnp.einsum('bqk,bkd->bqd', jax.nn.softmax(scores, axis=-1), v) @ wo + bo
    h = _ref_layer_norm(x + attn, ln1w, ln1b)
    f = jnp.maximum(h @ w1 + b1, 0.0) @ w2 + b2
    return _ref_layer_norm(h + f, ln2w, ln2b)


def reference_forward(x_eye, enc_params, liner_params):
    outs = [_ref_encoder_layer(x_eye[:, :, s:e], p) for (s, e), p in zip(SLICES, enc_params)]
    x_all = jnp.concatenate(outs, axis=2)
    w, b, g, beta, rm, rv = liner_params
    y = x_all @ w + b
    return (y - rm) * lax.rsqrt(rv + BN_EPS) * g + beta


# ----------------------------------------------------------------------------
if __name__ == "__main__":
    key = jax.random.PRNGKey(0)
    kx, kp = jax.random.split(key)

    B, S, F = 2, 8, 33                        # batch, sequence, feature (12+4+2+4+11)
    x_eye = jax.random.normal(kx, (B, S, F), jnp.float32)

    pkeys = jax.random.split(kp, len(DIMS) + 1)
    enc_params = [init_encoder_params(pkeys[i], d) for i, d in enumerate(DIMS)]
    liner_params = init_liner_params(pkeys[-1])

    forward = build_forward(enc_params, liner_params, B, S)   # packs params once (host side)
    out = jax.block_until_ready(forward(x_eye))
    assert out.shape == (B, S, D_OUT), out.shape

    ref = jax.block_until_ready(reference_forward(x_eye, enc_params, liner_params))
    np.testing.assert_allclose(np.asarray(out), np.asarray(ref), rtol=2e-3, atol=2e-3)

    print("KERNEL_OK")
</pallas_src>

<mosaic_0001>
module attributes {stable_mosaic.version = 11 : i64} {
  func.func @_fused_kernel(%arg0: memref<2x8x40xf32, #tpu.memory_space<vmem>>, %arg1: memref<160x384xf32, #tpu.memory_space<vmem>>, %arg2: memref<600x80xf32, #tpu.memory_space<vmem>>, %arg3: memref<16x384xf32, #tpu.memory_space<vmem>>, %arg4: memref<2x8x10xf32, #tpu.memory_space<vmem>>) attributes {dimension_semantics = [], scalar_prefetch = 0 : i64, scratch_operands = 0 : i64, tpu.core_type = #tpu.core_type<tc>} {
    %c0 = arith.constant 0 : index
    %c0_0 = arith.constant 0 : index
    %c0_1 = arith.constant 0 : index
    %0 = vector.load %arg0[%c0, %c0_0, %c0_1] : memref<2x8x40xf32, #tpu.memory_space<vmem>>, vector<2x8x40xf32>
    %1 = vector.shape_cast %0 : vector<2x8x40xf32> to vector<16x40xf32>
    %c0_2 = arith.constant 0 : index
    %c0_3 = arith.constant 0 : index
    %2 = vector.load %arg2[%c0_2, %c0_3] : memref<600x80xf32, #tpu.memory_space<vmem>>, vector<40x80xf32>
    %cst = arith.constant dense<0.000000e+00> : vector<16x80xf32>
    %3 = tpu.matmul %1, %2, %cst {dimension_numbers = #tpu.dot_dimension_numbers<[1], [0], [0], [1], [0, 0, 1, 1], [], []>} : vector<16x40xf32>, vector<40x80xf32>, vector<16x80xf32> -> vector<16x80xf32>
    %c0_4 = arith.constant 0 : index
    %c0_5 = arith.constant 0 : index
    %4 = vector.load %arg1[%c0_4, %c0_5] : memref<160x384xf32, #tpu.memory_space<vmem>>, vector<80x384xf32>
    %cst_6 = arith.constant dense<0.000000e+00> : vector<16x384xf32>
    %5 = tpu.matmul %3, %4, %cst_6 {dimension_numbers = #tpu.dot_dimension_numbers<[1], [0], [0], [1], [0, 0, 1, 1], [], []>} : vector<16x80xf32>, vector<80x384xf32>, vector<16x384xf32> -> vector<16x384xf32>
    %c0_7 = arith.constant 0 : index
    %c0_8 = arith.constant 0 : index
    %6 = vector.load %arg3[%c0_7, %c0_8] : memref<16x384xf32, #tpu.memory_space<vmem>>, vector<1x384xf32>
    %7 = vector.broadcast %6 : vector<1x384xf32> to vector<16x384xf32>
    %8 = arith.addf %5, %7 : vector<16x384xf32>
    %9 = vector.extract_strided_slice %8 {offsets = [0, 0], sizes = [16, 80], strides = [1, 1]} : vector<16x384xf32> to vector<16x80xf32>
    %10 = vector.extract_strided_slice %8 {offsets = [0, 128], sizes = [16, 80], strides = [1, 1]} : vector<16x384xf32> to vector<16x80xf32>
    %11 = vector.extract_strided_slice %8 {offsets = [0, 256], sizes = [16, 80], strides = [1, 1]} : vector<16x384xf32> to vector<16x80xf32>
    %c440 = arith.constant 440 : index
    %c0_9 = arith.constant 0 : index
    %12 = vector.load %arg2[%c440, %c0_9] : memref<600x80xf32, #tpu.memory_space<vmem>>, vector<80x80xf32>
    %13 = tpu.concatenate %9, %9, %9, %9, %9 in 0 : vector<16x80xf32>, vector<16x80xf32>, vector<16x80xf32>, vector<16x80xf32>, vector<16x80xf32> -> vector<80x80xf32>
    %14 = arith.mulf %13, %12 : vector<80x80xf32>
    %cst_10 = arith.constant dense<0.000000e+00> : vector<80x16xf32>
    %15 = tpu.matmul %14, %10, %cst_10 {dimension_numbers = #tpu.dot_dimension_numbers<[1], [1], [0], [0], [0, 0, 1, 0], [], []>} : vector<80x80xf32>, vector<16x80xf32>, vector<80x16xf32> -> vector<80x16xf32>
    %c520 = arith.constant 520 : index
    %c0_11 = arith.constant 0 : index
    %16 = vector.load %arg2[%c520, %c0_11] : memref<600x80xf32, #tpu.memory_space<vmem>>, vector<80x16xf32>
    %17 = arith.addf %15, %16 : vector<80x16xf32>
    %cst_12 = arith.constant dense<0xFF800000> : vector<80xf32>
    %18 = vector.multi_reduction <maximumf>, %17, %cst_12 [1] : vector<80x16xf32> to vector<80xf32>
    %19 = vector.shape_cast %18 : vector<80xf32> to vector<80x1xf32>
    %20 = vector.broadcast %19 : vector<80x1xf32> to vector<80x16xf32>
    %21 = arith.subf %17, %20 : vector<80x16xf32>
    %22 = math.exp %21 : vector<80x16xf32>
    %cst_13 = arith.constant dense<0.000000e+00> : vector<80xf32>
    %23 = vector.multi_reduction <add>, %22, %cst_13 [1] : vector<80x16xf32> to vector<80xf32>
    %24 = vector.shape_cast %23 : vector<80xf32> to vector<80x1xf32>
    %25 = tpu.reciprocal %24 : vector<80x1xf32> -> vector<80x1xf32>
    %26 = vector.broadcast %25 : vector<80x1xf32> to vector<80x16xf32>
    %27 = arith.mulf %22, %26 : vector<80x16xf32>
    %cst_14 = arith.constant dense<0.000000e+00> : vector<80x80xf32>
    %28 = tpu.matmul %27, %11, %cst_14 {dimension_numbers = #tpu.dot_dimension_numbers<[1], [0], [0], [1], [0, 0, 1, 1], [], []>} : vector<80x16xf32>, vector<16x80xf32>, vector<80x80xf32> -> vector<80x80xf32>
    %29 = arith.mulf %28, %12 : vector<80x80xf32>
    %30 = vector.extract_strided_slice %29 {offsets = [0, 0], sizes = [16, 80], strides = [1, 1]} : vector<80x80xf32> to vector<16x80xf32>
    %31 = vector.extract_strided_slice %29 {offsets = [16, 0], sizes = [16, 80], strides = [1, 1]} : vector<80x80xf32> to vector<16x80xf32>
    %32 = arith.addf %30, %31 : vector<16x80xf32>
    %33 = vector.extract_strided_slice %29 {offsets = [32, 0], sizes = [16, 80], strides = [1, 1]} : vector<80x80xf32> to vector<16x80xf32>
    %34 = arith.addf %32, %33 : vector<16x80xf32>
    %35 = vector.extract_strided_slice %29 {offsets = [48, 0], sizes = [16, 80], strides = [1, 1]} : vector<80x80xf32> to vector<16x80xf32>
    %36 = arith.addf %34, %35 : vector<16x80xf32>
    %37 = vector.extract_strided_slice %29 {offsets = [64, 0], sizes = [16, 80], strides = [1, 1]} : vector<80x80xf32> to vector<16x80xf32>
    %38 = arith.addf %36, %37 : vector<16x80xf32>
    %c200 = arith.constant 200 : index
    %c0_15 = arith.constant 0 : index
    %39 = vector.load %arg2[%c200, %c0_15] : memref<600x80xf32, #tpu.memory_space<vmem>>, vector<80x80xf32>
    %cst_16 = arith.constant dense<0.000000e+00> : vector<16x80xf32>
    %40 = tpu.matmul %38, %39, %cst_16 {dimension_numbers = #tpu.dot_dimension_numbers<[1], [0], [0], [1], [0, 0, 1, 1], [], []>} : vector<16x80xf32>, vector<80x80xf32>, vector<16x80xf32> -> vector<16x80xf32>
    %c1 = arith.constant 1 : index
    %c0_17 = arith.constant 0 : index
    %41 = vector.load %arg3[%c1, %c0_17] : memref<16x384xf32, #tpu.memory_space<vmem>>, vector<1x80xf32>
    %42 = vector.broadcast %41 : vector<1x80xf32> to vector<16x80xf32>
    %43 = arith.addf %40, %42 : vector<16x80xf32>
    %c280 = arith.constant 280 : index
    %c0_18 = arith.constant 0 : index
    %44 = vector.load %arg2[%c280, %c0_18] : memref<600x80xf32, #tpu.memory_space<vmem>>, vector<80x80xf32>
    %45 = arith.addf %3, %43 : vector<16x80xf32>
    %cst_19 = arith.constant dense<0.000000e+00> : vector<16x80xf32>
    %46 = tpu.matmul %45, %44, %cst_19 {dimension_numbers = #tpu.dot_dimension_numbers<[1], [0], [0], [1], [0, 0, 1, 1], [], []>} : vector<16x80xf32>, vector<80x80xf32>, vector<16x80xf32> -> vector<16x80xf32>
    %47 = arith.subf %45, %46 : vector<16x80xf32>
    %48 = arith.mulf %47, %47 : vector<16x80xf32>
    %cst_20 = arith.constant dense<0.000000e+00> : vector<16x80xf32>
    %49 = tpu.matmul %48, %44, %cst_20 {dimension_numbers = #tpu.dot_dimension_numbers<[1], [0], [0], [1], [0, 0, 1, 1], [], []>} : vector<16x80xf32>, vector<80x80xf32>, vector<16x80xf32> -> vector<16x80xf32>
    %cst_21 = arith.constant 9.99999974E-6 : f32
    %50 = vector.broadcast %cst_21 : f32 to vector<16x80xf32>
    %51 = arith.addf %49, %50 : vector<16x80xf32>
    %52 = math.rsqrt %51 : vector<16x80xf32>
    %53 = arith.mulf %47, %52 : vector<16x80xf32>
    %c2 = arith.constant 2 : index
    %c0_22 = arith.constant 0 : index
    %54 = vector.load %arg3[%c2, %c0_22] : memref<16x384xf32, #tpu.memory_space<vmem>>, vector<1x80xf32>
    %55 = vector.broadcast %54 : vector<1x80xf32> to vector<16x80xf32>
    %56 = arith.mulf %53, %55 : vector<16x80xf32>
    %c3 = arith.constant 3 : index
    %c0_23 = arith.constant 0 : index
    %57 = vector.load %arg3[%c3, %c0_23] : memref<16x384xf32, #tpu.memory_space<vmem>>, vector<1x80xf32>
    %58 = vector.broadcast %57 : vector<1x80xf32> to vector<16x80xf32>
    %59 = arith.addf %56, %58 : vector<16x80xf32>
    %c80 = arith.constant 80 : index
    %c0_24 = arith.constant 0 : index
    %60 = vector.load %arg1[%c80, %c0_24] : memref<160x384xf32, #tpu.memory_space<vmem>>, vector<80x160xf32>
    %cst_25 = arith.constant dense<0.000000e+00> : vector<16x160xf32>
    %61 = tpu.matmul %59, %60, %cst_25 {dimension_numbers = #tpu.dot_dimension_numbers<[1], [0], [0], [1], [0, 0, 1, 1], [], []>} : vector<16x80xf32>, vector<80x160xf32>, vector<16x160xf32> -> vector<16x160xf32>
    %c4 = arith.constant 4 : index
    %c0_26 = arith.constant 0 : index
    %62 = vector.load %arg3[%c4, %c0_26] : memref<16x384xf32, #tpu.memory_space<vmem>>, vector<1x160xf32>
    %63 = vector.broadcast %62 : vector<1x160xf32> to vector<16x160xf32>
    %64 = arith.addf %61, %63 : vector<16x160xf32>
    %cst_27 = arith.constant 0.000000e+00 : f32
    %65 = vector.broadcast %cst_27 : f32 to vector<16x160xf32>
    %66 = arith.maximumf %64, %65 : vector<16x160xf32>
    %c40 = arith.constant 40 : index
    %c0_28 = arith.constant 0 : index
    %67 = vector.load %arg2[%c40, %c0_28] : memref<600x80xf32, #tpu.memory_space<vmem>>, vector<160x80xf32>
    %cst_29 = arith.constant dense<0.000000e+00> : vector<16x80xf32>
    %68 = tpu.matmul %66, %67, %cst_29 {dimension_numbers = #tpu.dot_dimension_numbers<[1], [0], [0], [1], [0, 0, 1, 1], [], []>} : vector<16x160xf32>, vector<160x80xf32>, vector<16x80xf32> -> vector<16x80xf32>
    %c5 = arith.constant 5 : index
    %c0_30 = arith.constant 0 : index
    %69 = vector.load %arg3[%c5, %c0_30] : memref<16x384xf32, #tpu.memory_space<vmem>>, vector<1x80xf32>
    %70 = vector.broadcast %69 : vector<1x80xf32> to vector<16x80xf32>
    %71 = arith.addf %68, %70 : vector<16x80xf32>
    %72 = arith.addf %59, %71 : vector<16x80xf32>
    %cst_31 = arith.constant dense<0.000000e+00> : vector<16x80xf32>
    %73 = tpu.matmul %72, %44, %cst_31 {dimension_numbers = #tpu.dot_dimension_numbers<[1], [0], [0], [1], [0, 0, 1, 1], [], []>} : vector<16x80xf32>, vector<80x80xf32>, vector<16x80xf32> -> vector<16x80xf32>
    %74 = arith.subf %72, %73 : vector<16x80xf32>
    %75 = arith.mulf %74, %74 : vector<16x80xf32>
    %cst_32 = arith.constant dense<0.000000e+00> : vector<16x80xf32>
    %76 = tpu.matmul %75, %44, %cst_32 {dimension_numbers = #tpu.dot_dimension_numbers<[1], [0], [0], [1], [0, 0, 1, 1], [], []>} : vector<16x80xf32>, vector<80x80xf32>, vector<16x80xf32> -> vector<16x80xf32>
    %cst_33 = arith.constant 9.99999974E-6 : f32
    %77 = vector.broadcast %cst_33 : f32 to vector<16x80xf32>
    %78 = arith.addf %76, %77 : vector<16x80xf32>
    %79 = math.rsqrt %78 : vector<16x80xf32>
    %80 = arith.mulf %74, %79 : vector<16x80xf32>
    %c6 = arith.constant 6 : index
    %c0_34 = arith.constant 0 : index
    %81 = vector.load %arg3[%c6, %c0_34] : memref<16x384xf32, #tpu.memory_space<vmem>>, vector<1x80xf32>
    %82 = vector.broadcast %81 : vector<1x80xf32> to vector<16x80xf32>
    %83 = arith.mulf %80, %82 : vector<16x80xf32>
    %c7 = arith.constant 7 : index
    %c0_35 = arith.constant 0 : index
    %84 = vector.load %arg3[%c7, %c0_35] : memref<16x384xf32, #tpu.memory_space<vmem>>, vector<1x80xf32>
    %85 = vector.broadcast %84 : vector<1x80xf32> to vector<16x80xf32>
    %86 = arith.addf %83, %85 : vector<16x80xf32>
    %c360 = arith.constant 360 : index
    %c0_36 = arith.constant 0 : index
    %87 = vector.load %arg2[%c360, %c0_36] : memref<600x80xf32, #tpu.memory_space<vmem>>, vector<80x80xf32>
    %cst_37 = arith.constant dense<0.000000e+00> : vector<16x80xf32>
    %88 = tpu.matmul %86, %87, %cst_37 {dimension_numbers = #tpu.dot_dimension_numbers<[1], [0], [0], [1], [0, 0, 1, 1], [], []>} : vector<16x80xf32>, vector<80x80xf32>, vector<16x80xf32> -> vector<16x80xf32>
    %89 = vector.extract_strided_slice %88 {offsets = [0, 0], sizes = [16, 10], strides = [1, 1]} : vector<16x80xf32> to vector<16x10xf32>
    %c8 = arith.constant 8 : index
    %c0_38 = arith.constant 0 : index
    %90 = vector.load %arg3[%c8, %c0_38] : memref<16x384xf32, #tpu.memory_space<vmem>>, vector<1x10xf32>
    %91 = vector.broadcast %90 : vector<1x10xf32> to vector<16x10xf32>
    %92 = arith.addf %89, %91 : vector<16x10xf32>
    %93 = vector.shape_cast %92 : vector<16x10xf32> to vector<2x8x10xf32>
    %c0_39 = arith.constant 0 : index
    %c0_40 = arith.constant 0 : index
    %c0_41 = arith.constant 0 : index
    %94 = vector.load %arg4[%c0_39, %c0_40, %c0_41] : memref<2x8x10xf32, #tpu.memory_space<vmem>>, vector<2x8x10xf32>
    tpu.vector_store %arg4[%c0_39, %c0_40, %c0_41], %93 {strides = array<i32>} : memref<2x8x10xf32, #tpu.memory_space<vmem>>, vector<2x8x10xf32>,
    return
  }
}

</mosaic_0001>

<bundles_post_ra>
// kernel: _forward_impl.1
= control target key start
LH: loop header
LB: loop body
LE: loop exit
PB: predicated region body
PF: predicated region fallthrough
CT: control target
= control target key end

     0   :  { %vm25_vm0 = vcmask 326656   ;;  %s2709_s0 = inlined_call_operand.vmem [shape: f32[2,8,40], index: 0, kind: input, shape index: {}]   ;;  %s2710_s1 = inlined_call_operand.vmem [shape: f32[160,384], index: 1, kind: input, shape index: {}]   ;;  %s2711_s2 = inlined_call_operand.vmem [shape: f32[600,80], index: 2, kind: input, shape index: {}]   ;;  %s2712_s3 = inlined_call_operand.vmem [shape: f32[16,384], index: 3, kind: input, shape index: {}]   ;;  %s2713_s4 = inlined_call_operand.hbm [shape: f32[2,8,10], index: 4, kind: output, shape index: {}]  }
   0x1   :  { %v24_v0 = vld [vmem:[%s2711_s2 + $0x20] sm:$0xff]  ;;  %v23_v1 = vld [vmem:[%s2711_s2 + $0x18] sm:$0xff]  ;;  %v22_v3 = vld [vmem:[%s2711_s2 + $0x10] sm:$0xff] }
   0x2   :  { %1722 = vmatprep.subr.mxu0 %v24_v0  ;;  %v18_v2 = vld [vmem:[%s2709_s0] sm:$0xff]  ;;  %v134_v5 = vld [vmem:[%s2710_s1 + $0xd8] sm:$0xff]  ;;  %v132_v6 = vld [vmem:[%s2710_s1 + $0xc8] sm:$0xff] }
   0x3   :  { %1723 = vmatpush3.msra.mxu0 %v24_v0  ;;  %1732 = vmatprep.mubr.msk.f32.mxu0 %vm25_vm0, %v18_v2  ;;  %v135_v4 = vld [vmem:[%s2710_s1 + $0xe0] sm:$0xff]  ;;  %v21_v8 = vld [vmem:[%s2711_s2 + $0x8] sm:$0xff]  ;;  %v129_v9 = vld [vmem:[%s2710_s1 + $0xb0] sm:$0xff] }
   0x4   :  { %1724 = vmatprep.subr.mxu0 %v23_v1  ;;  %173 = vmatprep.subr.mxu1 %v135_v4  ;;  %v131_v7 = vld [vmem:[%s2710_s1 + $0xc0] sm:$0xff]  ;;  %v128_v10 = vld [vmem:[%s2710_s1 + $0xa8] sm:$0xff]  ;;  %v126_v12 = vld [vmem:[%s2710_s1 + $0x98] sm:$0xff] }
   0x5   :  { %1725 = vmatpush3.msra.mxu0 %v23_v1  ;;  %174 = vmatpush1.msra.mxu1 %v134_v5  ;;  %v20_v11 = vld [vmem:[%s2711_s2] sm:$0xff]  ;;  %v125_v13 = vld [vmem:[%s2710_s1 + $0x90] sm:$0xff]  ;;  %v19_v14 = vld [vmem:[%s2709_s0 + $0x8] sm:$0xff] }
   0x6   :  { %1726 = vmatprep.subr.mxu0 %v22_v3  ;;  %175 = vmatprep.subr.mxu1 %v132_v6  ;;  %v136_v15 = vld [vmem:[%s2710_s1 + $0xe8] sm:$0xff]  ;;  %v123_v16 = vld [vmem:[%s2710_s1 + $0x80] sm:$0xff]  ;;  %v133_v17 = vld [vmem:[%s2710_s1 + $0xd0] sm:$0xff] }
   0x7   :  { %1727 = vmatpush3.msra.mxu0 %v22_v3  ;;  %176 = vmatpush1.msra.mxu1 %v131_v7  ;;  %v122_v18 = vld [vmem:[%s2710_s1 + $0x78] sm:$0xff] }
   0x8   :  { %1728 = vmatprep.subr.mxu0 %v21_v8  ;;  %177 = vmatprep.subr.mxu1 %v129_v9 }
   0x9   :  { %1729 = vmatpush3.msra.mxu0 %v21_v8  ;;  %178 = vmatpush1.msra.mxu1 %v128_v10 }
   0xa   :  { %1730 = vmatprep.subr.mxu0 %v20_v11  ;;  %179 = vmatprep.subr.mxu1 %v126_v12 }
   0xb   :  { %1731 = vmatpush3.msra.mxu0 %v20_v11  ;;  %180 = vmatpush1.msra.mxu1 %v125_v13 }
   0xc   :  { %9 = vsyncpa [#allocation3], 0  ;;  %1733 = vmatmul.mubr.msk.f32.vlgmr.msra.gmra.mxu0 %vm25_vm0, %v19_v14  ;;  %1735 = vmatprep.subr.mxu0 %v136_v15  ;;  %v120_v19 = vld [vmem:[%s2710_s1 + $0x68] sm:$0xff]  ;;  %v130_v20 = vld [vmem:[%s2710_s1 + $0xb8] sm:$0xff]  ;;  %v2008_v37 = vmov 0.0   ;;  %vm154_vm1 = vcmask 654336   ;;  %v139_v40 = vlaneseq }
   0xd   :  { %1736 = vmatpush3.msra.mxu0 %v136_v15  ;;  %181 = vmatprep.subr.mxu1 %v123_v16  ;;  %v119_v21 = vld [vmem:[%s2710_s1 + $0x60] sm:$0xff]  ;;  %v117_v22 = vld [vmem:[%s2710_s1 + $0x50] sm:$0xff]  ;;  %v116_v24 = vld [vmem:[%s2710_s1 + $0x48] sm:$0xff]  ;;  %vm494_vm2 = vcmask 130048   ;;  %vm1189_vm3 = vcmask 261120   ;;  %vm1543_vm4 = vcmask 80896  }
   0xe   :  { %1737 = vmatprep.subr.mxu0 %v133_v17  ;;  %182 = vmatpush1.msra.mxu1 %v122_v18  ;;  %v127_v23 = vld [vmem:[%s2710_s1 + $0xa0] sm:$0xff]  ;;  %v114_v25 = vld [vmem:[%s2710_s1 + $0x38] sm:$0xff]  ;;  %v124_v26 = vld [vmem:[%s2710_s1 + $0x88] sm:$0xff]  ;;  %v2164_v41 = vshrl.u32 %v139_v40, 7  ;;  %s2009_s14 = smov [#allocation2]  }
   0xf   :  { %1738 = vmatpush3.msra.mxu0 %v133_v17  ;;  %183 = vmatprep.subr.mxu1 %v120_v19  ;;  %v113_v27 = vld [vmem:[%s2710_s1 + $0x30] sm:$0xff]  ;;  %v111_v28 = vld [vmem:[%s2710_s1 + $0x20] sm:$0xff]  ;;  %v118_v30 = vld [vmem:[%s2710_s1 + $0x58] sm:$0xff]  ;;  %s1551_s15 = sshll.u32 %s2009_s14, 4  ;;  %s1552_s15 = int_to_ptr.vmem [resolvable:$true] %s1551_s15 }
  0x10   :  { %1739 = vmatprep.subr.mxu0 %v130_v20  ;;  %184 = vmatpush1.msra.mxu1 %v119_v21  ;;  %v121_v29 = vld [vmem:[%s2710_s1 + $0x70] sm:$0xff]  ;;  %v115_v31 = vld [vmem:[%s2710_s1 + $0x40] sm:$0xff]  ;;  %v110_v32 = vld [vmem:[%s2710_s1 + $0x18] sm:$0xff]  ;;  %v141_v42 = vsub.s32 0, %v2164_v41  ;;  %v149_v44 = vsub.s32 2, %v2164_v41  ;;  %v145_v51 = vsub.s32 1, %v2164_v41  ;;  %p1991_p1 = scmp.lt.s32.totalorder %s1552_s15, %s1552_s15 }
  0x11   :  { %1740 = vmatpush3.msra.mxu0 %v130_v20  ;;  %185 = vmatprep.subr.mxu1 %v117_v22  ;;  %v112_v33 = vld [vmem:[%s2710_s1 + $0x28] sm:$0xff]  ;;  %v107_v35 = vld [vmem:[%s2710_s1] sm:$0xff]  ;;  %v109_v36 = vld [vmem:[%s2710_s1 + $0x10] sm:$0xff]  ;;  %s1986_s16 = scalar_lea.vmem %s1552_s15, 256 }
  0x12   :  { %1741 = vmatprep.subr.mxu0 %v127_v23  ;;  %186 = vmatpush1.msra.mxu1 %v116_v24  ;;  %v108_v34 = vld [vmem:[%s2710_s1 + $0x8] sm:$0xff]  ;;  %v2176_v48 = vld [vmem:[%s2711_s2 + $0x1b8] sm:$0xff]  ;;  %v2189_v63 = vld [vmem:[%s2711_s2 + $0x1c0] sm:$0xff]  ;;  %p1987_p0 = scmp.ne.s32.totalorder %s1552_s15, %s1986_s16  ;;  %p1992_p2 = scmp.lt.s32.totalorder %s1986_s16, %s1986_s16 }
  0x13   :  { %1742 = vmatpush3.msra.mxu0 %v127_v23  ;;  %187 = vmatprep.subr.mxu1 %v114_v25  ;;  %v137_v43 = vld [vmem:[%s2712_s3] ss:$8 sm:$0x7]  ;;  %v2208_v4 = vld [vmem:[%s2711_s2 + $0x1d8] sm:$0xff]  ;;  %v1188_v41 = vld [vmem:[%s2712_s3 + $0x5] ss:$0 sm:$0xff] }
  0x14   :  { %1743 = vmatprep.subr.mxu0 %v124_v26  ;;  %188 = vmatpush1.msra.mxu1 %v113_v27  ;;  %v142_v45 = vrot.slane %v137_v43, %v141_v42  ;;  %v150_v46 = vrot.slane %v137_v43, %v149_v44  ;;  %v146_v58 = vrot.slane %v137_v43, %v145_v51  ;;  %v2194_v0 = vld [vmem:[%s2711_s2 + $0x1c8] sm:$0xff]  ;;  %v2202_v3 = vld [vmem:[%s2711_s2 + $0x1d0] sm:$0xff]  ;;  %v2216_v7 = vld [vmem:[%s2711_s2 + $0x1e0] sm:$0xff]  ;;  %p1993_p3 = por %p1992_p2, %p1991_p1 }
  0x15   :  { %1744 = vmatpush3.msra.mxu0 %v124_v26  ;;  %189 = vmatprep.subr.mxu1 %v111_v28  ;;  %v2222_v8 = vld [vmem:[%s2711_s2 + $0x1e8] sm:$0xff]  ;;  %v2230_v11 = vld [vmem:[%s2711_s2 + $0x1f0] sm:$0xff]  ;;  %v2236_v12 = vld [vmem:[%s2711_s2 + $0x1f8] sm:$0xff] }
  0x16   :  { %1745 = vmatprep.subr.mxu0 %v121_v29  ;;  %190 = vmatpush1.msra.mxu1 %v110_v32  ;;  %v2244_v15 = vld [vmem:[%s2711_s2 + $0x200] sm:$0xff]  ;;  %v333_v18 = vld [vmem:[%s2711_s2 + $0x208] sm:$0xff]  ;;  %v334_v19 = vld [vmem:[%s2711_s2 + $0x210] sm:$0xff]  ;;  %p1994_p4 = pnand %p1993_p3, %p1987_p0 }
  0x17   :  { %1746 = vmatpush3.msra.mxu0 %v121_v29  ;;  %191 = vmatprep.subr.mxu1 %v108_v34  ;;  %v335_v23 = vld [vmem:[%s2711_s2 + $0x218] sm:$0xff]  ;;  %v336_v26 = vld [vmem:[%s2711_s2 + $0x220] sm:$0xff]  ;;  %v338_v34 = vld [vmem:[%s2711_s2 + $0x230] sm:$0xff] }
  0x18   :  { %1747 = vmatprep.subr.mxu0 %v118_v30  ;;  %192 = vmatpush1.msra.mxu1 %v107_v35  ;;  %v339_v43 = vld [vmem:[%s2711_s2 + $0x238] sm:$0xff] }
  0x19   :  { %1748 = vmatpush3.msra.mxu0 %v118_v30  ;;  %225 = vmatprep.mubr.f32.mxu1 %v2008_v37  ;;  %v337_v30 = vld [vmem:[%s2711_s2 + $0x228] sm:$0xff] }
  0x1a   :  { %1749 = vmatprep.subr.mxu0 %v115_v31 }
  0x1b   :  { %1750 = vmatpush3.msra.mxu0 %v115_v31 }
  0x1c   :  { %1751 = vmatprep.subr.mxu0 %v112_v33 }
  0x1d   :  { %1752 = vmatpush3.msra.mxu0 %v112_v33 }
  0x1e   :  { %1753 = vmatprep.subr.mxu0 %v109_v36 }
  0x1f   :  { %1754 = vmatpush3.msra.mxu0 %v109_v36 }
  0xcc   :  { %v2151_v38 = vpop.f32.mrf.mxu0 }
  0xce   :  { %v2153_v39 = vpop.f32.mrf.mxu0 }
  0xcf   :  { %1564 = vmatmul.mubr.msk.f32.vlgmr.msra.gmra.mxu1 %vm154_vm1, %v2153_v39  ;;  %1755 = vmatprep.mubr.msk.f32.mxu0 %vm154_vm1, %v2153_v39 }
  0xd0   :  { %1756 = vmatmul.mubr.msk.f32.vlgmr.msra.gmra.mxu0 %vm154_vm1, %v2151_v38  ;;  %231 = vmatprep.mubr.f32.mxu1 %v2008_v37 }
  0xd3   :  { %1565 = vmatmul.mubr.msk.f32.gmra.mxu1 %vm154_vm1, %v2151_v38 }
 0x18f   :  { %v227_v47 = vpop.f32.mrf.mxu1 }
 0x190   :  { %v228_v49 = vadd.f32 %v227_v47, %v142_v45  ;;  %v1757_v50 = vpop.f32.mrf.mxu0  ;;  %v340_v47 = vld [vmem:[%s2711_s2 + $0x240] sm:$0xff] }
 0x191   :  { %v310_v52 = vadd.f32 %v1757_v50, %v150_v46  ;;  %v229_v53 = vpop.f32.mrf.mxu1 }
 0x192   :  { %v304_v54 = vpop.f32.mrf.mxu0  ;;  %v323_v55 = vmul.f32 %v2176_v48, %v228_v49  ;;  %v230_v61 = vadd.f32 %v229_v53, %v146_v58  ;;  %v325_v2 = vmul.f32 %v2194_v0, %v228_v49  ;;  %v327_v6 = vmul.f32 %v2208_v4, %v228_v49  ;;  %v341_v53 = vld [vmem:[%s2711_s2 + $0x248] sm:$0xff] }
 0x193   :  { %v305_v56 = vadd.f32 %v304_v54, %v150_v46  ;;  %v233_v57 = vpop.f32.mrf.mxu1  ;;  %1777 = vmatprep.subr.mxu0 %v310_v52  ;;  %v329_v10 = vmul.f32 %v2222_v8, %v228_v49  ;;  %v331_v14 = vmul.f32 %v2236_v12, %v228_v49 }
 0x194   :  { %1762 = vmatprep.mubr.msk.f32.mxu1 %vm154_vm1, %v323_v55  ;;  %1778 = vmatpush3.msra.mxu0 %v310_v52  ;;  %v234_v62 = vadd.f32 %v233_v57, %v142_v45  ;;  %v342_v57 = vld [vmem:[%s2711_s2 + $0x250] sm:$0xff] }
 0x195   :  { %v235_v59 = vpop.f32.mrf.mxu1  ;;  %1779 = vmatprep.subr.mxu0 %v305_v56 }
 0x196   :  { %v236_v60 = vadd.f32 %v235_v59, %v146_v58  ;;  %1780 = vmatpush3.msra.mxu0 %v305_v56  ;;  %v324_v1 = vmul.f32 %v2189_v63, %v234_v62  ;;  %v326_v5 = vmul.f32 %v2202_v3, %v234_v62  ;;  %v328_v9 = vmul.f32 %v2216_v7, %v234_v62 }
 0x197   :  { %v330_v13 = vmul.f32 %v2230_v11, %v234_v62  ;;  %v332_v16 = vmul.f32 %v2244_v15, %v234_v62 }
 0x198   :  { %1758 = vmatprep.subr.msk.mxu1 %vm154_vm1, %v236_v60 }
 0x199   :  { %1759 = vmatpush3.xpose.msk.msra.mxu1 %vm154_vm1, %v236_v60 }
 0x19a   :  { %1760 = vmatprep.subr.msk.mxu1 %vm154_vm1, %v230_v61 }
 0x19d   :  { %1761 = vmatpush3.xpose.msk.msra.mxu1 %vm154_vm1, %v230_v61 }
 0x1a0   :  { %1763 = vmatmul.mubr.msk.f32.vlgmr.msra.gmra.mxu1 %vm154_vm1, %v324_v1 }
 0x1a1   :  { %1765 = vmatprep.mubr.msk.f32.mxu1 %vm154_vm1, %v325_v2 }
 0x1a4   :  { %1766 = vmatmul.mubr.msk.f32.gmra.mxu1 %vm154_vm1, %v326_v5 }
 0x1a5   :  { %1768 = vmatprep.mubr.msk.f32.mxu1 %vm154_vm1, %v327_v6 }
 0x1a8   :  { %1769 = vmatmul.mubr.msk.f32.gmra.mxu1 %vm154_vm1, %v328_v9 }
 0x1a9   :  { %1771 = vmatprep.mubr.msk.f32.mxu1 %vm154_vm1, %v329_v10 }
 0x1ac   :  { %1772 = vmatmul.mubr.msk.f32.gmra.mxu1 %vm154_vm1, %v330_v13 }
 0x1ad   :  { %1774 = vmatprep.mubr.msk.f32.mxu1 %vm154_vm1, %v331_v14 }
 0x1b0   :  { %1775 = vmatmul.mubr.msk.f32.gmra.mxu1 %vm154_vm1, %v332_v16 }
 0x260   :  { %v1764_v17 = vpop.f32.mrf.mxu1 }
 0x261   :  { %v451_v24 = vadd.f32 %v1764_v17, %v334_v19 }
 0x262   :  { %v445_v20 = vpop.f32.mrf.mxu1 }
 0x263   :  { %v446_v21 = vadd.f32 %v445_v20, %v333_v18  ;;  %v498_v33 = vsel %vm494_vm2, %v451_v24, -inf }
 0x264   :  { %v1767_v22 = vpop.f32.mrf.mxu1 }
 0x265   :  { %v495_v25 = vsel %vm494_vm2, %v446_v21, -inf  ;;  %v461_v31 = vadd.f32 %v1767_v22, %v336_v26 }
 0x266   :  { %v455_v27 = vpop.f32.mrf.mxu1  ;;  %496 = vmax.xlane.f32.xlu0 %v495_v25 }
 0x267   :  { %v456_v28 = vadd.f32 %v455_v27, %v335_v23  ;;  %v504_v45 = vsel %vm494_vm2, %v461_v31, -inf }
 0x268   :  { %v1770_v29 = vpop.f32.mrf.mxu1 }
 0x269   :  { %v501_v32 = vsel %vm494_vm2, %v456_v28, -inf  ;;  %v471_v44 = vadd.f32 %v1770_v29, %v338_v34 }
 0x26a   :  { %v465_v35 = vpop.f32.mrf.mxu1  ;;  %502 = vmax.xlane.f32.xlu1 %v501_v32  ;;  %499 = vmax.xlane.f32.xlu0 %v498_v33 }
 0x26b   :  { %v466_v36 = vadd.f32 %v465_v35, %v337_v30  ;;  %v510_v55 = vsel %vm494_vm2, %v471_v44, -inf }
 0x26c   :  { %v1773_v40 = vpop.f32.mrf.mxu1 }
 0x26d   :  { %v507_v46 = vsel %vm494_vm2, %v466_v36, -inf  ;;  %v481_v54 = vadd.f32 %v1773_v40, %v340_v47 }
 0x26e   :  { %v475_v49 = vpop.f32.mrf.mxu1  ;;  %505 = vmax.xlane.f32.xlu1 %v504_v45  ;;  %508 = vmax.xlane.f32.xlu0 %v507_v46 }
 0x26f   :  { %v476_v50 = vadd.f32 %v475_v49, %v339_v43  ;;  %v516_v61 = vsel %vm494_vm2, %v481_v54, -inf }
 0x270   :  { %v1776_v52 = vpop.f32.mrf.mxu1 }
 0x271   :  { %v513_v56 = vsel %vm494_vm2, %v476_v50, -inf  ;;  %v491_v60 = vadd.f32 %v1776_v52, %v342_v57 }
 0x272   :  { %v485_v58 = vpop.f32.mrf.mxu1  ;;  %511 = vmax.xlane.f32.xlu1 %v510_v55  ;;  %514 = vmax.xlane.f32.xlu0 %v513_v56 }
 0x273   :  { %v486_v59 = vadd.f32 %v485_v58, %v341_v53  ;;  %v522_v1 = vsel %vm494_vm2, %v491_v60, -inf }
 0x275   :  { %v519_v62 = vsel %vm494_vm2, %v486_v59, -inf }
 0x276   :  { %517 = vmax.xlane.f32.xlu1 %v516_v61  ;;  %520 = vmax.xlane.f32.xlu0 %v519_v62 }
 0x27a   :  { %523 = vmax.xlane.f32.xlu1 %v522_v1 }
 0x2ef   :  { %v497_v2 = vpop.xlane.xlu0 %496 }
 0x2f0   :  { %v525_v5 = vsub.f32 %v446_v21, %v497_v2 }
 0x2f2   :  { %v535_v6 = vmul.f32 1.442695, %v525_v5 }
 0x2f3   :  { %v503_v9 = vpop.xlane.xlu1 %502  ;;  %v500_v10 = vpop.xlane.xlu0 %499 }
 0x2f4   :  { %1938 = vpow2.f32 %v535_v6  ;;  %v527_v13 = vsub.f32 %v456_v28, %v503_v9  ;;  %v526_v14 = vsub.f32 %v451_v24, %v500_v10 }
 0x2f6   :  { %v539_v16 = vmul.f32 1.442695, %v527_v13  ;;  %v537_v17 = vmul.f32 1.442695, %v526_v14 }
 0x2f7   :  { %v506_v18 = vpop.xlane.xlu1 %505  ;;  %v509_v19 = vpop.xlane.xlu0 %508 }
 0x2f8   :  { %1940 = vpow2.f32 %v539_v16  ;;  %v528_v20 = vsub.f32 %v461_v31, %v506_v18  ;;  %v529_v22 = vsub.f32 %v466_v36, %v509_v19 }
 0x2f9   :  { %1942 = vpow2.f32 %v537_v17 }
 0x2fa   :  { %v541_v23 = vmul.f32 1.442695, %v528_v20  ;;  %v543_v25 = vmul.f32 1.442695, %v529_v22 }
 0x2fb   :  { %v512_v26 = vpop.xlane.xlu1 %511  ;;  %v515_v27 = vpop.xlane.xlu0 %514 }
 0x2fc   :  { %1944 = vpow2.f32 %v541_v23  ;;  %v530_v21 = vsub.f32 %v471_v44, %v512_v26  ;;  %v531_v29 = vsub.f32 %v476_v50, %v515_v27 }
 0x2fd   :  { %1946 = vpow2.f32 %v543_v25 }
 0x2fe   :  { %v545_v30 = vmul.f32 1.442695, %v530_v21  ;;  %v547_v32 = vmul.f32 1.442695, %v531_v29 }
 0x2ff   :  { %v518_v28 = vpop.xlane.xlu1 %517  ;;  %v521_v24 = vpop.xlane.xlu0 %520 }
 0x300   :  { %1948 = vpow2.f32 %v545_v30  ;;  %v532_v33 = vsub.f32 %v481_v54, %v518_v28  ;;  %v533_v34 = vsub.f32 %v486_v59, %v521_v24 }
 0x301   :  { %v1939_v35 = vpop.eup %1938  ;;  %1950 = vpow2.f32 %v547_v32 }
 0x302   :  { %v549_v31 = vmul.f32 1.442695, %v532_v33  ;;  %v551_v36 = vmul.f32 1.442695, %v533_v34  ;;  %v555_v40 = vsel %vm494_vm2, %v1939_v35, 0.0 }
 0x303   :  { %v524_v43 = vpop.xlane.xlu1 %523  ;;  %556 = vadd.xlane.f32.xlu0 %v555_v40 }
 0x304   :  { %1952 = vpow2.f32 %v549_v31  ;;  %v534_v45 = vsub.f32 %v491_v60, %v524_v43 }
 0x305   :  { %v1941_v44 = vpop.eup %1940  ;;  %1954 = vpow2.f32 %v551_v36 }
 0x306   :  { %v1943_v46 = vpop.eup %1942  ;;  %v553_v47 = vmul.f32 1.442695, %v534_v45  ;;  %v561_v49 = vsel %vm494_vm2, %v1941_v44, 0.0 }
 0x307   :  { %562 = vadd.xlane.f32.xlu0 %v561_v49  ;;  %v558_v50 = vsel %vm494_vm2, %v1943_v46, 0.0  ;;  %v775_v49 = vld [vmem:[%s2711_s2 + $0x100] sm:$0xff] }
 0x308   :  { %1956 = vpow2.f32 %v553_v47  ;;  %559 = vadd.xlane.f32.xlu1 %v558_v50  ;;  %v776_v47 = vld [vmem:[%s2711_s2 + $0x108] sm:$0xff]  ;;  %v774_v50 = vld [vmem:[%s2711_s2 + $0xf8] sm:$0xff] }
 0x309   :  { %v1945_v52 = vpop.eup %1944 }
 0x30a   :  { %v1947_v53 = vpop.eup %1946  ;;  %v564_v54 = vsel %vm494_vm2, %v1945_v52, 0.0 }
 0x30b   :  { %v567_v55 = vsel %vm494_vm2, %v1947_v53, 0.0 }
 0x30c   :  { %565 = vadd.xlane.f32.xlu1 %v564_v54  ;;  %568 = vadd.xlane.f32.xlu0 %v567_v55  ;;  %v771_v54 = vld [vmem:[%s2711_s2 + $0xe0] sm:$0xff]  ;;  %v770_v55 = vld [vmem:[%s2711_s2 + $0xd8] sm:$0xff] }
 0x30d   :  { %v1949_v56 = vpop.eup %1948 }
 0x30e   :  { %v1951_v57 = vpop.eup %1950  ;;  %v570_v58 = vsel %vm494_vm2, %v1949_v56, 0.0 }
 0x30f   :  { %v573_v59 = vsel %vm494_vm2, %v1951_v57, 0.0 }
 0x310   :  { %571 = vadd.xlane.f32.xlu1 %v570_v58  ;;  %574 = vadd.xlane.f32.xlu0 %v573_v59  ;;  %v2343_v58 = vld [vmem:[%s2711_s2 + $0x160] sm:$0xff]  ;;  %v2348_v59 = vld [vmem:[%s2711_s2 + $0x158] sm:$0xff] }
 0x311   :  { %v1953_v60 = vpop.eup %1952  ;;  %1819 = vmatprep.subr.mxu0 %v2343_v58 }
 0x312   :  { %v1955_v61 = vpop.eup %1954  ;;  %v576_v62 = vsel %vm494_vm2, %v1953_v60, 0.0 }
 0x313   :  { %v579_v1 = vsel %vm494_vm2, %v1955_v61, 0.0 }
 0x314   :  { %577 = vadd.xlane.f32.xlu1 %v576_v62  ;;  %580 = vadd.xlane.f32.xlu0 %v579_v1  ;;  %v2370_v62 = vld [vmem:[%s2711_s2 + $0x140] sm:$0xff]  ;;  %v2377_v1 = vld [vmem:[%s2711_s2 + $0x138] sm:$0xff] }
 0x315   :  { %v1957_v2 = vpop.eup %1956 }
 0x316   :  { %v582_v5 = vsel %vm494_vm2, %v1957_v2, 0.0 }
 0x318   :  { %583 = vadd.xlane.f32.xlu1 %v582_v5 }
 0x38c   :  { %v557_v6 = vpop.xlane.xlu0 %556 }
 0x38d   :  { %1958 = vrcp.f32 %v557_v6 }
 0x390   :  { %v563_v9 = vpop.xlane.xlu0 %562 }
 0x391   :  { %v560_v10 = vpop.xlane.xlu1 %559  ;;  %1960 = vrcp.f32 %v563_v9 }
 0x392   :  { %1962 = vrcp.f32 %v560_v10 }
 0x395   :  { %v566_v13 = vpop.xlane.xlu1 %565  ;;  %v569_v14 = vpop.xlane.xlu0 %568 }
 0x396   :  { %1964 = vrcp.f32 %v566_v13 }
 0x397   :  { %1966 = vrcp.f32 %v569_v14 }
 0x399   :  { %v572_v16 = vpop.xlane.xlu1 %571  ;;  %v575_v17 = vpop.xlane.xlu0 %574 }
 0x39a   :  { %v1959_v18 = vpop.eup %1958  ;;  %1968 = vrcp.f32 %v572_v16 }
 0x39b   :  { %1970 = vrcp.f32 %v575_v17  ;;  %v595_v19 = vmul.f32 %v1959_v18, %v1939_v35 }
 0x39d   :  { %v578_v20 = vpop.xlane.xlu1 %577  ;;  %v581_v22 = vpop.xlane.xlu0 %580  ;;  %1781 = vmatprep.mubr.msk.f32.mxu0 %vm494_vm2, %v595_v19 }
 0x39e   :  { %v1961_v23 = vpop.eup %1960  ;;  %1972 = vrcp.f32 %v578_v20 }
 0x39f   :  { %v1963_v25 = vpop.eup %1962  ;;  %1974 = vrcp.f32 %v581_v22  ;;  %v597_v26 = vmul.f32 %v1961_v23, %v1941_v44 }
 0x3a0   :  { %v596_v27 = vmul.f32 %v1963_v25, %v1943_v46  ;;  %v777_v46 = vld [vmem:[%s2711_s2 + $0x110] sm:$0xff] }
 0x3a1   :  { %v584_v21 = vpop.xlane.xlu1 %583  ;;  %1796 = vmatprep.subr.mxu1 %v777_v46 }
 0x3a2   :  { %1976 = vrcp.f32 %v584_v21  ;;  %1782 = vmatmul.mubr.msk.f32.vlgmr.msra.gmra.mxu0 %vm494_vm2, %v596_v27  ;;  %1797 = vmatpush3.msra.mxu1 %v777_v46 }
 0x3a3   :  { %v1965_v29 = vpop.eup %1964  ;;  %1784 = vmatprep.mubr.msk.f32.mxu0 %vm494_vm2, %v597_v26  ;;  %1798 = vmatprep.subr.mxu1 %v776_v47 }
 0x3a4   :  { %v1967_v30 = vpop.eup %1966  ;;  %v598_v32 = vmul.f32 %v1965_v29, %v1945_v52  ;;  %1799 = vmatpush3.msra.mxu1 %v776_v47  ;;  %v773_v52 = vld [vmem:[%s2711_s2 + $0xf0] sm:$0xff]  ;;  %1820 = vmatpush3.msra.mxu0 %v2343_v58 }
 0x3a5   :  { %v599_v28 = vmul.f32 %v1967_v30, %v1947_v53  ;;  %1800 = vmatprep.subr.mxu1 %v775_v49  ;;  %v772_v53 = vld [vmem:[%s2711_s2 + $0xe8] sm:$0xff]  ;;  %1821 = vmatprep.subr.mxu0 %v2348_v59 }
 0x3a6   :  { %1785 = vmatmul.mubr.msk.f32.gmra.mxu0 %vm494_vm2, %v598_v32  ;;  %1801 = vmatpush3.msra.mxu1 %v775_v49  ;;  %v1066_v49 = vld [vmem:[%s2710_s1 + $0x1c8] sm:$0xff] }
 0x3a7   :  { %v1969_v24 = vpop.eup %1968  ;;  %1787 = vmatprep.mubr.msk.f32.mxu0 %vm494_vm2, %v599_v28  ;;  %1802 = vmatprep.subr.mxu1 %v774_v50 }
 0x3a8   :  { %v1971_v33 = vpop.eup %1970  ;;  %v600_v34 = vmul.f32 %v1969_v24, %v1949_v56  ;;  %1803 = vmatpush3.msra.mxu1 %v774_v50  ;;  %v769_v56 = vld [vmem:[%s2711_s2 + $0xd0] sm:$0xff]  ;;  %1822 = vmatpush3.msra.mxu0 %v2348_v59  ;;  %v1065_v50 = vld [vmem:[%s2710_s1 + $0x1b8] sm:$0xff] }
 0x3a9   :  { %v601_v35 = vmul.f32 %v1971_v33, %v1951_v57  ;;  %1804 = vmatprep.subr.mxu1 %v773_v52  ;;  %v768_v57 = vld [vmem:[%s2711_s2 + $0xc8] sm:$0xff] }
 0x3aa   :  { %1788 = vmatmul.mubr.msk.f32.gmra.mxu0 %vm494_vm2, %v600_v34  ;;  %1805 = vmatpush3.msra.mxu1 %v773_v52  ;;  %v1064_v52 = vld [vmem:[%s2710_s1 + $0x1b0] sm:$0xff] }
 0x3ab   :  { %v1973_v31 = vpop.eup %1972  ;;  %1790 = vmatprep.mubr.msk.f32.mxu0 %vm494_vm2, %v601_v35  ;;  %1806 = vmatprep.subr.mxu1 %v772_v53 }
 0x3ac   :  { %v1975_v36 = vpop.eup %1974  ;;  %v602_v40 = vmul.f32 %v1973_v31, %v1953_v60  ;;  %1807 = vmatpush3.msra.mxu1 %v772_v53  ;;  %v2356_v60 = vld [vmem:[%s2711_s2 + $0x150] sm:$0xff]  ;;  %v1063_v53 = vld [vmem:[%s2710_s1 + $0x1a0] sm:$0xff] }
 0x3ad   :  { %v603_v43 = vmul.f32 %v1975_v36, %v1955_v61  ;;  %1808 = vmatprep.subr.mxu1 %v771_v54  ;;  %v2363_v61 = vld [vmem:[%s2711_s2 + $0x148] sm:$0xff]  ;;  %1823 = vmatprep.subr.mxu0 %v2356_v60 }
 0x3ae   :  { %1791 = vmatmul.mubr.msk.f32.gmra.mxu0 %vm494_vm2, %v602_v40  ;;  %1809 = vmatpush3.msra.mxu1 %v771_v54  ;;  %v1062_v54 = vld [vmem:[%s2710_s1 + $0x198] sm:$0xff] }
 0x3af   :  { %v1977_v45 = vpop.eup %1976  ;;  %1793 = vmatprep.mubr.msk.f32.mxu0 %vm494_vm2, %v603_v43  ;;  %1810 = vmatprep.subr.mxu1 %v770_v55 }
 0x3b0   :  { %v604_v44 = vmul.f32 %v1977_v45, %v1957_v2  ;;  %1811 = vmatpush3.msra.mxu1 %v770_v55  ;;  %1824 = vmatpush3.msra.mxu0 %v2356_v60  ;;  %v1061_v55 = vld [vmem:[%s2710_s1 + $0x188] sm:$0xff] }
 0x3b1   :  { %1812 = vmatprep.subr.mxu1 %v769_v56  ;;  %1825 = vmatprep.subr.mxu0 %v2363_v61 }
 0x3b2   :  { %1794 = vmatmul.mubr.msk.f32.gmra.mxu0 %vm494_vm2, %v604_v44  ;;  %1813 = vmatpush3.msra.mxu1 %v769_v56  ;;  %v1060_v56 = vld [vmem:[%s2710_s1 + $0x180] sm:$0xff] }
 0x3b3   :  { %1814 = vmatprep.subr.mxu1 %v768_v57  ;;  %1826 = vmatpush3.msra.mxu0 %v2363_v61 }
 0x3b4   :  { %1815 = vmatpush3.msra.mxu1 %v768_v57  ;;  %1827 = vmatprep.subr.mxu0 %v2370_v62  ;;  %v1059_v57 = vld [vmem:[%s2710_s1 + $0x170] sm:$0xff] }
 0x3b5   :  { %1842 = vmatprep.subr.mxu1 %v2343_v58  ;;  %1828 = vmatpush3.msra.mxu0 %v2370_v62 }
 0x3b6   :  { %1829 = vmatprep.subr.mxu0 %v2377_v1 }
 0x3b7   :  { %1830 = vmatpush3.msra.mxu0 %v2377_v1 }
 0x462   :  { %v1783_v2 = vpop.f32.mrf.mxu0 }
 0x463   :  { %v751_v20 = vmul.f32 %v1783_v2, %v2189_v63  ;;  %v1058_v2 = vld [vmem:[%s2710_s1 + $0x168] sm:$0xff] }
 0x464   :  { %v701_v5 = vpop.f32.mrf.mxu0 }
 0x465   :  { %v750_v18 = vmul.f32 %v701_v5, %v2176_v48  ;;  %v1057_v5 = vld [vmem:[%s2710_s1 + $0x158] sm:$0xff] }
 0x466   :  { %v1786_v6 = vpop.f32.mrf.mxu0 }
 0x467   :  { %v753_v16 = vmul.f32 %v1786_v6, %v2202_v3  ;;  %v1056_v6 = vld [vmem:[%s2710_s1 + $0x150] sm:$0xff] }
 0x468   :  { %v711_v9 = vpop.f32.mrf.mxu0 }
 0x469   :  { %v752_v14 = vmul.f32 %v711_v9, %v2194_v0  ;;  %v761_v27 = vadd.f32 %v753_v16, %v751_v20  ;;  %v1055_v9 = vld [vmem:[%s2710_s1 + $0x140] sm:$0xff]  ;;  %v1051_v16 = vld [vmem:[%s2710_s1 + $0x110] sm:$0xff] }
 0x46a   :  { %v1789_v10 = vpop.f32.mrf.mxu0  ;;  %v1183_v20 = vld [vmem:[%s2711_s2 + $0xa0] sm:$0xff] }
 0x46b   :  { %v755_v22 = vmul.f32 %v1789_v10, %v2216_v7  ;;  %v760_v25 = vadd.f32 %v752_v14, %v750_v18  ;;  %v2409_v7 = vld [vmem:[%s2711_s2 + $0x130] sm:$0xff]  ;;  %v1054_v10 = vld [vmem:[%s2710_s1 + $0x138] sm:$0xff]  ;;  %v1052_v14 = vld [vmem:[%s2710_s1 + $0x120] sm:$0xff] }
 0x46c   :  { %v721_v13 = vpop.f32.mrf.mxu0  ;;  %1831 = vmatprep.subr.mxu0 %v2409_v7  ;;  %v1049_v18 = vld [vmem:[%s2710_s1 + $0xf8] sm:$0xff] }
 0x46d   :  { %v754_v19 = vmul.f32 %v721_v13, %v2208_v4  ;;  %v763_v30 = vadd.f32 %v761_v27, %v755_v22  ;;  %1832 = vmatpush3.msra.mxu0 %v2409_v7  ;;  %v1053_v13 = vld [vmem:[%s2710_s1 + $0x128] sm:$0xff]  ;;  %v1182_v22 = vld [vmem:[%s2711_s2 + $0x98] sm:$0xff] }
 0x46e   :  { %v1792_v17 = vpop.f32.mrf.mxu0  ;;  %v1178_v27 = vld [vmem:[%s2711_s2 + $0x78] sm:$0xff] }
 0x46f   :  { %v757_v21 = vmul.f32 %v1792_v17, %v2230_v11  ;;  %v762_v0 = vadd.f32 %v760_v25, %v754_v19  ;;  %v2426_v11 = vld [vmem:[%s2711_s2 + $0x120] sm:$0xff]  ;;  %v1050_v17 = vld [vmem:[%s2710_s1 + $0x108] sm:$0xff]  ;;  %v1048_v19 = vld [vmem:[%s2710_s1 + $0xf0] sm:$0xff] }
 0x470   :  { %v731_v23 = vpop.f32.mrf.mxu0  ;;  %v1180_v25 = vld [vmem:[%s2711_s2 + $0x88] sm:$0xff] }
 0x471   :  { %v756_v26 = vmul.f32 %v731_v23, %v2222_v8  ;;  %v765_v28 = vadd.f32 %v763_v30, %v757_v21  ;;  %v2417_v8 = vld [vmem:[%s2711_s2 + $0x128] sm:$0xff]  ;;  %v1181_v23 = vld [vmem:[%s2711_s2 + $0x90] sm:$0xff]  ;;  %v1174_v30 = vld [vmem:[%s2711_s2 + $0x58] sm:$0xff] }
 0x472   :  { %v1795_v29 = vpop.f32.mrf.mxu0  ;;  %1833 = vmatprep.subr.mxu0 %v2417_v8  ;;  %v1177_v21 = vld [vmem:[%s2711_s2 + $0x70] sm:$0xff] }
 0x473   :  { %v759_v3 = vmul.f32 %v1795_v29, %v2244_v15  ;;  %v764_v48 = vadd.f32 %v762_v0, %v756_v26  ;;  %1834 = vmatpush3.msra.mxu0 %v2417_v8  ;;  %v778_v15 = vld [vmem:[%s2712_s3 + $0x1] ss:$0 sm:$0xff]  ;;  %v1176_v29 = vld [vmem:[%s2711_s2 + $0x68] sm:$0xff] }
 0x474   :  { %v741_v32 = vpop.f32.mrf.mxu0  ;;  %1835 = vmatprep.subr.mxu0 %v2426_v11  ;;  %v1179_v26 = vld [vmem:[%s2711_s2 + $0x80] sm:$0xff] }
 0x475   :  { %v758_v4 = vmul.f32 %v741_v32, %v2236_v12  ;;  %v767_v24 = vadd.f32 %v765_v28, %v759_v3  ;;  %v2433_v12 = vld [vmem:[%s2711_s2 + $0x118] sm:$0xff]  ;;  %1836 = vmatpush3.msra.mxu0 %v2426_v11  ;;  %v1175_v0 = vld [vmem:[%s2711_s2 + $0x60] sm:$0xff]  ;;  %v1173_v3 = vld [vmem:[%s2711_s2 + $0x50] sm:$0xff] }
 0x476   :  { %1837 = vmatprep.subr.mxu0 %v2433_v12  ;;  %v1172_v32 = vld [vmem:[%s2711_s2 + $0x48] sm:$0xff]  ;;  %v1169_v28 = vld [vmem:[%s2711_s2 + $0x30] sm:$0xff] }
 0x477   :  { %v766_v63 = vadd.f32 %v764_v48, %v758_v4  ;;  %1838 = vmatpush3.msra.mxu0 %v2433_v12  ;;  %v1171_v48 = vld [vmem:[%s2711_s2 + $0x40] sm:$0xff]  ;;  %v1170_v4 = vld [vmem:[%s2711_s2 + $0x38] sm:$0xff] }
 0x479   :  { %1816 = vmatprep.mubr.msk.f32.mxu1 %vm154_vm1, %v766_v63  ;;  %v1168_v63 = vld [vmem:[%s2711_s2 + $0x28] sm:$0xff] }
 0x47a   :  { %1817 = vmatmul.mubr.msk.f32.vlgmr.msra.gmra.mxu1 %vm154_vm1, %v767_v24 }
 0x47b   :  { %1843 = vmatpush3.msra.mxu1 %v2343_v58 }
 0x47c   :  { %1844 = vmatprep.subr.mxu1 %v2348_v59 }
 0x47d   :  { %1845 = vmatpush3.msra.mxu1 %v2348_v59 }
 0x47e   :  { %1846 = vmatprep.subr.mxu1 %v2356_v60 }
 0x47f   :  { %1847 = vmatpush3.msra.mxu1 %v2356_v60 }
 0x480   :  { %1848 = vmatprep.subr.mxu1 %v2363_v61 }
 0x481   :  { %1849 = vmatpush3.msra.mxu1 %v2363_v61 }
 0x482   :  { %1850 = vmatprep.subr.mxu1 %v2370_v62 }
 0x483   :  { %1851 = vmatpush3.msra.mxu1 %v2370_v62 }
 0x484   :  { %1852 = vmatprep.subr.mxu1 %v2377_v1 }
 0x485   :  { %1853 = vmatpush3.msra.mxu1 %v2377_v1 }
 0x486   :  { %1854 = vmatprep.subr.mxu1 %v2409_v7 }
 0x487   :  { %1855 = vmatpush3.msra.mxu1 %v2409_v7 }
 0x488   :  { %1856 = vmatprep.subr.mxu1 %v2417_v8 }
 0x489   :  { %1857 = vmatpush3.msra.mxu1 %v2417_v8 }
 0x48a   :  { %1858 = vmatprep.subr.mxu1 %v2426_v11 }
 0x48b   :  { %1859 = vmatpush3.msra.mxu1 %v2426_v11 }
 0x48c   :  { %1860 = vmatprep.subr.mxu1 %v2433_v12 }
 0x48d   :  { %1861 = vmatpush3.msra.mxu1 %v2433_v12 }
 0x48e   :  { %1196 = vmatprep.subr.mxu1 %v2008_v37 }
 0x53a   :  { %v1818_v33 = vpop.f32.mrf.mxu1 }
 0x53b   :  { %v857_v34 = vadd.f32 %v1818_v33, %v778_v15 }
 0x53c   :  { %v851_v35 = vpop.f32.mrf.mxu1 }
 0x53d   :  { %v852_v31 = vadd.f32 %v851_v35, %v778_v15  ;;  %v871_v40 = vadd.f32 %v2151_v38, %v857_v34  ;;  %v1067_v38 = vld [vmem:[%s2710_s1 + $0x1d0] sm:$0xff] }
 0x53e   :  { %1099 = vmatprep.subr.mxu0 %v1067_v38 }
 0x53f   :  { %v870_v36 = vadd.f32 %v852_v31, %v2153_v39 }
 0x541   :  { %1839 = vmatprep.mubr.msk.f32.mxu0 %vm154_vm1, %v870_v36 }
 0x542   :  { %1840 = vmatmul.mubr.msk.f32.vlgmr.msra.gmra.mxu0 %vm154_vm1, %v871_v40 }
 0x543   :  { %1151 = vmatprep.mubr.f32.mxu0 %v2008_v37  ;;  %1100 = vmatpush1.msra.mxu0 %v1066_v49  ;;  %v1186_v49 = vld [vmem:[%s2711_s2 + $0xb8] sm:$0xff] }
 0x544   :  { %1101 = vmatprep.subr.mxu0 %v1065_v50  ;;  %v1185_v50 = vld [vmem:[%s2711_s2 + $0xb0] sm:$0xff] }
 0x545   :  { %1102 = vmatpush1.msra.mxu0 %v1064_v52  ;;  %v1184_v52 = vld [vmem:[%s2711_s2 + $0xa8] sm:$0xff] }
 0x546   :  { %1103 = vmatprep.subr.mxu0 %v1063_v53  ;;  %v1596_v53 = vld [vmem:[%s2712_s3 + $0x4] ss:$8 sm:$0x3] }
 0x547   :  { %1104 = vmatpush1.msra.mxu0 %v1062_v54  ;;  %v1074_v54 = vrot.slane %v1596_v53, %v141_v42 }
 0x548   :  { %1105 = vmatprep.subr.mxu0 %v1061_v55  ;;  %v1078_v55 = vrot.slane %v1596_v53, %v145_v51 }
 0x549   :  { %1106 = vmatpush1.msra.mxu0 %v1060_v56 }
 0x54a   :  { %1107 = vmatprep.subr.mxu0 %v1059_v57 }
 0x54b   :  { %1108 = vmatpush1.msra.mxu0 %v1058_v2 }
 0x54c   :  { %1109 = vmatprep.subr.mxu0 %v1057_v5 }
 0x54d   :  { %1110 = vmatpush1.msra.mxu0 %v1056_v6 }
 0x54e   :  { %1111 = vmatprep.subr.mxu0 %v1055_v9 }
 0x54f   :  { %1112 = vmatpush1.msra.mxu0 %v1054_v10 }
 0x550   :  { %1113 = vmatprep.subr.mxu0 %v1053_v13 }
 0x551   :  { %1114 = vmatpush1.msra.mxu0 %v1052_v14 }
 0x552   :  { %1115 = vmatprep.subr.mxu0 %v1051_v16 }
 0x553   :  { %1116 = vmatpush1.msra.mxu0 %v1050_v17 }
 0x554   :  { %1117 = vmatprep.subr.mxu0 %v1049_v18 }
 0x555   :  { %1118 = vmatpush1.msra.mxu0 %v1048_v19 }
 0x556   :  { %1865 = vmatprep.subr.mxu0 %v2343_v58 }
 0x602   :  { %v1841_v43 = vpop.f32.mrf.mxu0 }
 0x603   :  { %v2451_v45 = vsub.f32 %v871_v40, %v1841_v43  ;;  %v1042_v43 = vld [vmem:[%s2712_s3 + $0x2] ss:$0 sm:$0xff] }
 0x604   :  { %v944_v44 = vpop.f32.mrf.mxu0 }
 0x605   :  { %v2453_v46 = vsub.f32 %v870_v36, %v944_v44  ;;  %v956_v39 = vmul.f32 %v2451_v45, %v2451_v45 }
 0x607   :  { %v955_v47 = vmul.f32 %v2453_v46, %v2453_v46 }
 0x609   :  { %1862 = vmatprep.mubr.msk.f32.mxu1 %vm154_vm1, %v955_v47  ;;  %v1045_v47 = vld [vmem:[%s2712_s3 + $0x3] ss:$0 sm:$0xff] }
 0x60a   :  { %1863 = vmatmul.mubr.msk.f32.vlgmr.msra.gmra.mxu1 %vm154_vm1, %v956_v39 }
 0x60b   :  { %1197 = vmatpush1.msra.mxu1 %v1183_v20 }
 0x60c   :  { %1198 = vmatprep.subr.mxu1 %v2008_v37 }
 0x60d   :  { %1199 = vmatpush1.msra.mxu1 %v1182_v22 }
 0x60e   :  { %1200 = vmatprep.subr.mxu1 %v2008_v37 }
 0x60f   :  { %1201 = vmatpush1.msra.mxu1 %v1181_v23 }
 0x610   :  { %1202 = vmatprep.subr.mxu1 %v2008_v37 }
 0x611   :  { %1203 = vmatpush1.msra.mxu1 %v1180_v25 }
 0x612   :  { %1204 = vmatprep.subr.mxu1 %v2008_v37 }
 0x613   :  { %1205 = vmatpush1.msra.mxu1 %v1179_v26  ;;  %v1454_v26 = vld [vmem:[%s2711_s2 + $0x190] sm:$0xff] }
 0x614   :  { %1206 = vmatprep.subr.mxu1 %v2008_v37 }
 0x615   :  { %1207 = vmatpush1.msra.mxu1 %v1178_v27  ;;  %v1453_v27 = vld [vmem:[%s2711_s2 + $0x188] sm:$0xff] }
 0x616   :  { %1208 = vmatprep.subr.mxu1 %v2008_v37 }
 0x617   :  { %1209 = vmatpush1.msra.mxu1 %v1177_v21  ;;  %v1452_v21 = vld [vmem:[%s2711_s2 + $0x180] sm:$0xff] }
 0x618   :  { %1210 = vmatprep.subr.mxu1 %v2008_v37 }
 0x619   :  { %1211 = vmatpush1.msra.mxu1 %v1176_v29  ;;  %v1451_v29 = vld [vmem:[%s2711_s2 + $0x178] sm:$0xff] }
 0x61a   :  { %1212 = vmatprep.subr.mxu1 %v2008_v37 }
 0x61b   :  { %1213 = vmatpush1.msra.mxu1 %v1175_v0  ;;  %v1450_v0 = vld [vmem:[%s2711_s2 + $0x170] sm:$0xff] }
 0x61c   :  { %1214 = vmatprep.subr.mxu1 %v2008_v37 }
 0x61d   :  { %1215 = vmatpush1.msra.mxu1 %v1174_v30  ;;  %v1449_v30 = vld [vmem:[%s2711_s2 + $0x168] sm:$0xff] }
 0x61e   :  { %1216 = vmatprep.subr.mxu1 %v2008_v37 }
 0x61f   :  { %1217 = vmatpush1.msra.mxu1 %v1173_v3 }
 0x620   :  { %1218 = vmatprep.subr.mxu1 %v2008_v37 }
 0x621   :  { %1219 = vmatpush1.msra.mxu1 %v1172_v32 }
 0x622   :  { %1220 = vmatprep.subr.mxu1 %v2008_v37 }
 0x623   :  { %1221 = vmatpush1.msra.mxu1 %v1171_v48 }
 0x624   :  { %1222 = vmatprep.subr.mxu1 %v2008_v37 }
 0x625   :  { %1223 = vmatpush1.msra.mxu1 %v1170_v4 }
 0x626   :  { %1224 = vmatprep.subr.mxu1 %v2008_v37 }
 0x627   :  { %1225 = vmatpush1.msra.mxu1 %v1169_v28 }
 0x628   :  { %1226 = vmatprep.subr.mxu1 %v2008_v37 }
 0x629   :  { %1227 = vmatpush1.msra.mxu1 %v1168_v63 }
 0x62a   :  { %1252 = vmatprep.subr.mxu1 %v2008_v37 }
 0x6ca   :  { %v1864_v24 = vpop.f32.mrf.mxu1 }
 0x6cb   :  { %v1035_v15 = vadd.f32 1e-05, %v1864_v24  ;;  %v1443_v24 = vld [vmem:[%s2712_s3 + $0x6] ss:$0 sm:$0xff] }
 0x6cc   :  { %v1029_v33 = vpop.f32.mrf.mxu1 }
 0x6cd   :  { %1978 = vrsqrt.f32 %v1035_v15  ;;  %v1030_v34 = vadd.f32 1e-05, %v1029_v33 }
 0x6cf   :  { %1980 = vrsqrt.f32 %v1030_v34 }
 0x6da   :  { %v1979_v35 = vpop.eup %1978 }
 0x6db   :  { %v1041_v40 = vmul.f32 %v1979_v35, %v2451_v45  ;;  %v1187_v45 = vld [vmem:[%s2711_s2 + $0xc0] sm:$0xff] }
 0x6dc   :  { %v1981_v31 = vpop.eup %1980  ;;  %1253 = vmatpush2.msra.mxu1 %v1187_v45 }
 0x6dd   :  { %v1040_v36 = vmul.f32 %v1981_v31, %v2453_v46  ;;  %v1044_v38 = vmul.f32 %v1042_v43, %v1041_v40  ;;  %1254 = vmatprep.subr.mxu1 %v2008_v37  ;;  %v1446_v31 = vld [vmem:[%s2712_s3 + $0x7] ss:$0 sm:$0xff] }
 0x6de   :  { %1255 = vmatpush2.msra.mxu1 %v1186_v49 }
 0x6df   :  { %v1043_v44 = vmul.f32 %v1042_v43, %v1040_v36  ;;  %v1047_v46 = vadd.f32 %v1045_v47, %v1044_v38  ;;  %1256 = vmatprep.subr.mxu1 %v2008_v37  ;;  %v1540_v43 = vld [vmem:[%s2712_s3 + $0x18] ss:$0 sm:$0xff] }
 0x6e0   :  { %1257 = vmatpush2.msra.mxu1 %v1185_v50 }
 0x6e1   :  { %v1046_v39 = vadd.f32 %v1045_v47, %v1043_v44  ;;  %1258 = vmatprep.subr.mxu1 %v2008_v37 }
 0x6e2   :  { %1259 = vmatpush2.msra.mxu1 %v1184_v52 }
 0x6e3   :  { %1597 = vmatmul.mubr.msk.f32.vlgmr.msra.gmra.mxu0 %vm154_vm1, %v1046_v39 }
 0x6e4   :  { %1157 = vmatprep.mubr.f32.mxu0 %v2008_v37  ;;  %1866 = vmatpush3.msra.mxu0 %v2343_v58 }
 0x6e5   :  { %1867 = vmatprep.subr.mxu0 %v2348_v59 }
 0x6e6   :  { %1868 = vmatpush3.msra.mxu0 %v2348_v59 }
 0x6e7   :  { %1598 = vmatmul.mubr.msk.f32.gmra.mxu0 %vm154_vm1, %v1047_v46  ;;  %1869 = vmatprep.subr.mxu0 %v2356_v60 }
 0x6e8   :  { %1870 = vmatpush3.msra.mxu0 %v2356_v60 }
 0x6e9   :  { %1871 = vmatprep.subr.mxu0 %v2363_v61 }
 0x6ea   :  { %1872 = vmatpush3.msra.mxu0 %v2363_v61 }
 0x6eb   :  { %1873 = vmatprep.subr.mxu0 %v2370_v62 }
 0x6ec   :  { %1874 = vmatpush3.msra.mxu0 %v2370_v62 }
 0x6ed   :  { %1875 = vmatprep.subr.mxu0 %v2377_v1 }
 0x6ee   :  { %1876 = vmatpush3.msra.mxu0 %v2377_v1 }
 0x6ef   :  { %1877 = vmatprep.subr.mxu0 %v2409_v7 }
 0x6f0   :  { %1878 = vmatpush3.msra.mxu0 %v2409_v7 }
 0x6f1   :  { %1879 = vmatprep.subr.mxu0 %v2417_v8 }
 0x6f2   :  { %1880 = vmatpush3.msra.mxu0 %v2417_v8 }
 0x6f3   :  { %1881 = vmatprep.subr.mxu0 %v2426_v11 }
 0x6f4   :  { %1882 = vmatpush3.msra.mxu0 %v2426_v11 }
 0x6f5   :  { %1883 = vmatprep.subr.mxu0 %v2433_v12 }
 0x6f6   :  { %1884 = vmatpush3.msra.mxu0 %v2433_v12 }
 0x6f7   :  { %1888 = vmatprep.subr.mxu0 %v2343_v58 }
 0x7a3   :  { %v1153_v56 = vpop.f32.mrf.mxu0 }
 0x7a4   :  { %v1154_v57 = vadd.f32 %v1153_v56, %v1074_v54 }
 0x7a5   :  { %v1155_v2 = vpop.f32.mrf.mxu0 }
 0x7a6   :  { %v1156_v5 = vadd.f32 %v1155_v2, %v1078_v55  ;;  %v1164_v9 = vmax.f32 %v1154_v57, 0.0 }
 0x7a7   :  { %v1159_v37 = vpop.f32.mrf.mxu0 }
 0x7a8   :  { %v1165_v6 = vmax.f32 %v1156_v5, 0.0  ;;  %v1160_v10 = vadd.f32 %v1159_v37, %v1074_v54 }
 0x7a9   :  { %v1161_v13 = vpop.f32.mrf.mxu0 }
 0x7aa   :  { %v1162_v14 = vadd.f32 %v1161_v13, %v1078_v55  ;;  %1599 = vmatprep.mubr.msk.f32.mxu1 %vm1189_vm3, %v1165_v6  ;;  %v1166_v17 = vmax.f32 %v1160_v10, 0.0 }
 0x7ab   :  { %1261 = vmatmul.mubr.f32.vlgmr.msra.gmra.mxu1 %v1164_v9 }
 0x7ac   :  { %v1167_v16 = vmax.f32 %v1162_v14, 0.0 }
 0x7ae   :  { %1600 = vmatprep.mubr.msk.f32.mxu1 %vm1189_vm3, %v1167_v16 }
 0x7af   :  { %1266 = vmatmul.mubr.f32.gmra.mxu1 %v1166_v17 }
 0x86b   :  { %v1262_v42 = vpop.f32.mrf.mxu1 }
 0x86c   :  { %v1263_v51 = vadd.f32 %v1262_v42, %v1188_v41 }
 0x86d   :  { %v1264_v18 = vpop.f32.mrf.mxu1 }
 0x86e   :  { %v1271_v19 = vadd.f32 %v1263_v51, %v1046_v39 }
 0x86f   :  { %v1267_v20 = vpop.f32.mrf.mxu1 }
 0x870   :  { %v1268_v22 = vadd.f32 %v1267_v20, %v1188_v41  ;;  %1885 = vmatprep.mubr.msk.f32.mxu0 %vm154_vm1, %v1271_v19 }
 0x871   :  { %v1269_v23 = vpop.f32.mrf.mxu1 }
 0x872   :  { %v1272_v25 = vadd.f32 %v1268_v22, %v1047_v46 }
 0x874   :  { %1886 = vmatmul.mubr.msk.f32.vlgmr.msra.gmra.mxu0 %vm154_vm1, %v1272_v25 }
 0x875   :  { %1889 = vmatpush3.msra.mxu0 %v2343_v58 }
 0x876   :  { %1890 = vmatprep.subr.mxu0 %v2348_v59 }
 0x877   :  { %1891 = vmatpush3.msra.mxu0 %v2348_v59 }
 0x878   :  { %1892 = vmatprep.subr.mxu0 %v2356_v60 }
 0x879   :  { %1893 = vmatpush3.msra.mxu0 %v2356_v60 }
 0x87a   :  { %1894 = vmatprep.subr.mxu0 %v2363_v61 }
 0x87b   :  { %1895 = vmatpush3.msra.mxu0 %v2363_v61 }
 0x87c   :  { %1896 = vmatprep.subr.mxu0 %v2370_v62 }
 0x87d   :  { %1897 = vmatpush3.msra.mxu0 %v2370_v62 }
 0x87e   :  { %1898 = vmatprep.subr.mxu0 %v2377_v1 }
 0x87f   :  { %1899 = vmatpush3.msra.mxu0 %v2377_v1 }
 0x880   :  { %1900 = vmatprep.subr.mxu0 %v2409_v7 }
 0x881   :  { %1901 = vmatpush3.msra.mxu0 %v2409_v7  ;;  %v1458_v7 = vld [vmem:[%s2711_s2 + $0x1b0] sm:$0xff] }
 0x882   :  { %1902 = vmatprep.subr.mxu0 %v2417_v8  ;;  %1911 = vmatprep.subr.mxu1 %v1458_v7 }
 0x883   :  { %1903 = vmatpush3.msra.mxu0 %v2417_v8  ;;  %v1457_v8 = vld [vmem:[%s2711_s2 + $0x1a8] sm:$0xff]  ;;  %1912 = vmatpush3.msra.mxu1 %v1458_v7 }
 0x884   :  { %1904 = vmatprep.subr.mxu0 %v2426_v11  ;;  %1913 = vmatprep.subr.mxu1 %v1457_v8 }
 0x885   :  { %1905 = vmatpush3.msra.mxu0 %v2426_v11  ;;  %v1456_v11 = vld [vmem:[%s2711_s2 + $0x1a0] sm:$0xff]  ;;  %1914 = vmatpush3.msra.mxu1 %v1457_v8 }
 0x886   :  { %1906 = vmatprep.subr.mxu0 %v2433_v12  ;;  %1915 = vmatprep.subr.mxu1 %v1456_v11 }
 0x887   :  { %1907 = vmatpush3.msra.mxu0 %v2433_v12  ;;  %v1455_v12 = vld [vmem:[%s2711_s2 + $0x198] sm:$0xff]  ;;  %1916 = vmatpush3.msra.mxu1 %v1456_v11 }
 0x888   :  { %1917 = vmatprep.subr.mxu1 %v1455_v12 }
 0x889   :  { %1918 = vmatpush3.msra.mxu1 %v1455_v12 }
 0x88a   :  { %1919 = vmatprep.subr.mxu1 %v1454_v26 }
 0x88b   :  { %1920 = vmatpush3.msra.mxu1 %v1454_v26 }
 0x88c   :  { %1921 = vmatprep.subr.mxu1 %v1453_v27 }
 0x88d   :  { %1922 = vmatpush3.msra.mxu1 %v1453_v27 }
 0x88e   :  { %1923 = vmatprep.subr.mxu1 %v1452_v21 }
 0x88f   :  { %1924 = vmatpush3.msra.mxu1 %v1452_v21 }
 0x890   :  { %1925 = vmatprep.subr.mxu1 %v1451_v29 }
 0x891   :  { %1926 = vmatpush3.msra.mxu1 %v1451_v29 }
 0x892   :  { %1927 = vmatprep.subr.mxu1 %v1450_v0 }
 0x893   :  { %1928 = vmatpush3.msra.mxu1 %v1450_v0 }
 0x894   :  { %1929 = vmatprep.subr.mxu1 %v1449_v30 }
 0x895   :  { %1930 = vmatpush3.msra.mxu1 %v1449_v30 }
 0x934   :  { %v1887_v58 = vpop.f32.mrf.mxu0 }
 0x935   :  { %v1355_v59 = vsub.f32 %v1272_v25, %v1887_v58 }
 0x936   :  { %v1345_v60 = vpop.f32.mrf.mxu0 }
 0x937   :  { %v1354_v61 = vsub.f32 %v1271_v19, %v1345_v60  ;;  %v1357_v1 = vmul.f32 %v1355_v59, %v1355_v59 }
 0x939   :  { %v1356_v62 = vmul.f32 %v1354_v61, %v1354_v61 }
 0x93b   :  { %1908 = vmatprep.mubr.msk.f32.mxu0 %vm154_vm1, %v1356_v62 }
 0x93c   :  { %1909 = vmatmul.mubr.msk.f32.vlgmr.msra.gmra.mxu0 %vm154_vm1, %v1357_v1 }
 0x9fc   :  { %v1910_v3 = vpop.f32.mrf.mxu0 }
 0x9fd   :  { %v1436_v32 = vadd.f32 1e-05, %v1910_v3 }
 0x9fe   :  { %v1430_v48 = vpop.f32.mrf.mxu0 }
 0x9ff   :  { %1982 = vrsqrt.f32 %v1436_v32  ;;  %v1431_v4 = vadd.f32 1e-05, %v1430_v48 }
 0xa01   :  { %1984 = vrsqrt.f32 %v1431_v4 }
 0xa0c   :  { %v1983_v28 = vpop.eup %1982 }
 0xa0d   :  { %v1442_v63 = vmul.f32 %v1983_v28, %v1355_v59 }
 0xa0e   :  { %v1985_v15 = vpop.eup %1984 }
 0xa0f   :  { %v1441_v33 = vmul.f32 %v1985_v15, %v1354_v61  ;;  %v1445_v34 = vmul.f32 %v1443_v24, %v1442_v63 }
 0xa11   :  { %v1444_v35 = vmul.f32 %v1443_v24, %v1441_v33  ;;  %v1448_v40 = vadd.f32 %v1446_v31, %v1445_v34 }
 0xa13   :  { %v1447_v36 = vadd.f32 %v1446_v31, %v1444_v35 }
 0xa15   :  { %1931 = vmatprep.mubr.msk.f32.mxu1 %vm154_vm1, %v1447_v36 }
 0xa16   :  { %1932 = vmatmul.mubr.msk.f32.vlgmr.msra.gmra.mxu1 %vm154_vm1, %v1448_v40 }
 0xad6   :  { %v1933_v44 = vpop.f32.mrf.mxu1 }
 0xad7   :  { %v1542_v47 = vadd.f32 %v1933_v44, %v1540_v43 }
 0xad8   :  { %v1531_v39 = vpop.f32.mrf.mxu1 }
 0xad9   :  { %1545 = vst.msk [vmem:[#allocation2 + $0x8] sm:$0xff] %vm1543_vm4, %v1542_v47  ;;  %v1541_v38 = vadd.f32 %v1540_v43, %v1531_v39 }
 0xadb   :  { %1544 = vst.msk [vmem:[#allocation2] sm:$0xff] %vm1543_vm4, %v1541_v38 }
 0xadc   :  { %1997 = shalt.err (!%p1994_p4)
}
 0xadd   :  { %s2010_s17 = smov 128   ;;  %s2011_s18 = smov 8  }
 0xade   :  { %1557 = dma.vmem_to_hbm [thread:$0]  %s1552_s15, 256, %s2713_s4, [#allocation3], %s2010_s17, %s2010_s17, %s2011_s18  }
 0xadf   :  { %2006 = dma.done.wait [#allocation3], 256  }
 0xae0   :  { %2007 = vsyncadd [#allocation3], 4294967040 }
 0xae1   :  { %1561 = vsyncpa [#allocation3], 1 }

</bundles_post_ra>
